<compile_context>
chip_gen: v7x
topology: tpu7x:2x2x1
jax: 0.10.0
libtpu: 0.0.40
codegen_flags: <defaults>
</compile_context>

<pallas_src>
import jax
import jax.numpy as jnp
from jax import lax
from jax.experimental import pallas as pl
from jax.experimental.pallas import tpu as pltpu


# ---------------------------------------------------------------------------
# Tuning knobs (conservative across v5e / v6e / v7x).
# ---------------------------------------------------------------------------
_RESIDENT_TABLE_MAX_BYTES = 8 * 1024 * 1024   # table kept VMEM-resident if <= this
_ONEHOT_MAX_VOCAB = 4096                      # keep (T, vocab) one-hot tiles small
_NUM_INFLIGHT = 8                             # row DMAs in flight on the HBM path
_DEFAULT_BLOCK_TOKENS = 256                   # max tokens per grid step


def _round_up(x, m):
    return (x + m - 1) // m * m


# ---------------------------------------------------------------------------
# Path A: VMEM-resident table, one-hot MXU gather.
# ---------------------------------------------------------------------------
def _resident_gather_kernel(ids_ref, table_ref, out_ref):
    # ids_ref:   (T, 1)  int32 VMEM  (ids for this token block)
    # table_ref: (V, D)  VMEM        (same block every step -> fetched once)
    # out_ref:   (T, D)  VMEM
    T = out_ref.shape[0]
    V = table_ref.shape[0]
    ids = ids_ref[...]                                              # (T, 1)
    col = lax.broadcasted_iota(jnp.int32, (T, V), 1)                # (T, V)
    onehot = (ids == col).astype(table_ref.dtype)                   # (T, V)
    out_ref[...] = jnp.dot(
        onehot, table_ref[...], preferred_element_type=jnp.float32
    ).astype(out_ref.dtype)


# ---------------------------------------------------------------------------
# Path B: table stays in HBM; manual multi-in-flight row DMA gather.
# ---------------------------------------------------------------------------
def _dma_gather_kernel(ids_ref, table_hbm, out_ref, sems):
    # ids_ref:   (n_pad,) int32 SMEM (scalar prefetch)
    # table_hbm: (V, D)   HBM ref (memory_space=pl.ANY)
    # out_ref:   (T, D)   VMEM output block for this token block
    # sems:      DMA semaphore array of depth _NUM_INFLIGHT
    T = out_ref.shape[0]
    base = pl.multiple_of(pl.program_id(0) * T, 8)

    def start_copy(tok, slot, row):
        pltpu.make_async_copy(table_hbm.at[row], out_ref.at[tok],
                              sems.at[slot]).start()

    # Prime the pipeline: _NUM_INFLIGHT row DMAs outstanding (T >= _NUM_INFLIGHT).
    for s in range(_NUM_INFLIGHT):            # static, small unrolled loop
        start_copy(s, s, ids_ref[base + s])

    def body(t, carry):
        slot = t % _NUM_INFLIGHT
        nxt = t + _NUM_INFLIGHT
        # Read the next row id from SMEM *before* the DMA wait so the wait
        # does not break SMEM sst->sld forwarding.
        nxt_row = ids_ref[base + jnp.minimum(nxt, T - 1)]
        # Wait for token t's row (wait descriptor only needs matching sizes).
        pltpu.make_async_copy(table_hbm.at[0], out_ref.at[t],
                              sems.at[slot]).wait()

        @pl.when(nxt < T)
        def _():
            start_copy(nxt, nxt % _NUM_INFLIGHT, nxt_row)

        return carry

    lax.fori_loop(0, T, body, 0)


# ---------------------------------------------------------------------------
# Wrapper
# ---------------------------------------------------------------------------
def embedding_lookup(ids, table, *, block_tokens=_DEFAULT_BLOCK_TOKENS,
                     force_dma_gather=False):
    """ids: int array of any shape; table: (vocab, dim).

    Returns ids.shape + (dim,), equivalent to table[ids] (ids clamped to range).
    """
    orig_shape = ids.shape
    vocab, dim = table.shape

    ids_flat = jnp.clip(ids.reshape(-1).astype(jnp.int32), 0, vocab - 1)
    n_tok = ids_flat.shape[0]
    if n_tok == 0:
        return jnp.zeros(orig_shape + (dim,), table.dtype)

    # Adaptive token block: never bigger than needed, always a multiple of 8
    # and at least _NUM_INFLIGHT (so the DMA pipeline can be primed).
    T = min(block_tokens, _round_up(n_tok, 8))
    T = _round_up(max(T, _NUM_INFLIGHT), 8)
    n_pad = pl.cdiv(n_tok, T) * T
    num_blocks = n_pad // T
    # Pad with id 0 (valid padding row); padded rows are sliced off below.
    ids_pad = jnp.pad(ids_flat, (0, n_pad - n_tok))

    table_bytes = vocab * dim * jnp.dtype(table.dtype).itemsize
    use_resident = (not force_dma_gather
                    and table_bytes <= _RESIDENT_TABLE_MAX_BYTES
                    and vocab <= _ONEHOT_MAX_VOCAB)

    if use_resident:
        out_flat = pl.pallas_call(
            _resident_gather_kernel,
            out_shape=jax.ShapeDtypeStruct((n_pad, dim), table.dtype),
            grid_spec=pltpu.PrefetchScalarGridSpec(
                num_scalar_prefetch=0,
                grid=(num_blocks,),
                in_specs=[
                    pl.BlockSpec((T, 1), lambda i: (i, 0)),          # ids block
                    pl.BlockSpec((vocab, dim), lambda i: (0, 0)),    # resident table
                ],
                out_specs=pl.BlockSpec((T, dim), lambda i: (i, 0)),
            ),
            compiler_params=pltpu.CompilerParams(
                dimension_semantics=("parallel",),
                vmem_limit_bytes=48 * 1024 * 1024,   # fits v7x's 64 MiB VMEM too
            ),
        )(ids_pad.reshape(n_pad, 1), table)
    else:
        out_flat = pl.pallas_call(
            _dma_gather_kernel,
            out_shape=jax.ShapeDtypeStruct((n_pad, dim), table.dtype),
            grid_spec=pltpu.PrefetchScalarGridSpec(
                num_scalar_prefetch=1,                               # ids -> SMEM
                grid=(num_blocks,),
                in_specs=[pl.BlockSpec(memory_space=pl.ANY)],        # table in HBM
                out_specs=pl.BlockSpec((T, dim), lambda i, ids: (i, 0)),
                scratch_shapes=[pltpu.SemaphoreType.DMA((_NUM_INFLIGHT,))],
            ),
            compiler_params=pltpu.CompilerParams(
                dimension_semantics=("parallel",),
            ),
        )(ids_pad, table)

    return out_flat[:n_tok].reshape(*orig_shape, dim)


class FastEmbeddingPallas:
    """JAX/Pallas port of FastEmbedding.

    Instead of loading word2vec vectors from a file, the table is initialized
    deterministically in-script (padding row 0 is zeroed, matching
    padding_idx=0). fine_tune=False means the table is simply a constant here.
    """

    def __init__(self, vocab_size, dim, key):
        table = jax.random.normal(key, (vocab_size, dim), dtype=jnp.float32)
        # padding_idx=0 -> zero row
        self.table = table.at[0].set(0.0)
        # TODO(synk): gensim KeyedVectors file loading (self.itos / pretrained
        # vectors) has no Pallas equivalent; vectors are synthetic here.

    def __call__(self, x):
        return embedding_lookup(x, self.table)


if __name__ == "__main__":
    key = jax.random.PRNGKey(0)
    k_tab, k_idx = jax.random.split(key)

    vocab_size = 64
    dim = 128
    batch, seq = 2, 8

    emb = FastEmbeddingPallas(vocab_size, dim, k_tab)
    x = jax.random.randint(k_idx, (batch, seq), 0, vocab_size, dtype=jnp.int32)

    ref = jnp.take(emb.table, x, axis=0)

    # Fast path: VMEM-resident table + one-hot MXU gather.
    out_a = jax.block_until_ready(emb(x))
    # Large-vocab path (forced here for coverage): manual multi-in-flight DMA gather.
    out_b = jax.block_until_ready(
        embedding_lookup(x, emb.table, force_dma_gather=True))

    assert out_a.shape == (batch, seq, dim), out_a.shape
    assert out_a.dtype == jnp.float32
    assert jnp.allclose(out_a, ref), "resident-table path mismatch vs reference"
    assert out_b.shape == (batch, seq, dim), out_b.shape
    assert jnp.allclose(out_b, ref), "DMA-gather path mismatch vs reference"

    print("KERNEL_OK")
</pallas_src>

<mosaic_0001>
module attributes {stable_mosaic.version = 11 : i64} {
  func.func @_resident_gather_kernel(%arg0: i32, %arg1: memref<16x1xi32, #tpu.memory_space<vmem>>, %arg2: memref<64x128xf32, #tpu.memory_space<vmem>>, %arg3: memref<16x128xf32, #tpu.memory_space<vmem>>) attributes {dimension_semantics = [#tpu.dimension_semantics<parallel>], iteration_bounds = array<i64: 1>, scalar_prefetch = 0 : i64, scratch_operands = 0 : i64, tpu.core_type = #tpu.core_type<tc>, window_params = [{transform_indices = @transform_0, window_bounds = array<i64: 16, 1>}, {pipeline_mode = #tpu.pipeline_mode<synchronous>, transform_indices = @transform_1, window_bounds = array<i64: 64, 128>}, {transform_indices = @transform_2, window_bounds = array<i64: 16, 128>}]} {
    %c0 = arith.constant 0 : index
    %c0_0 = arith.constant 0 : index
    %0 = vector.load %arg1[%c0, %c0_0] : memref<16x1xi32, #tpu.memory_space<vmem>>, vector<16x1xi32>
    %1 = tpu.iota {dimensions = array<i32: 1>} : vector<16x64xi32>
    %2 = vector.broadcast %0 : vector<16x1xi32> to vector<16x64xi32>
    %3 = arith.cmpi eq, %2, %1 : vector<16x64xi32>
    %4 = arith.extui %3 : vector<16x64xi1> to vector<16x64xi32>
    %5 = arith.sitofp %4 : vector<16x64xi32> to vector<16x64xf32>
    %c0_1 = arith.constant 0 : index
    %c0_2 = arith.constant 0 : index
    %6 = vector.load %arg2[%c0_1, %c0_2] : memref<64x128xf32, #tpu.memory_space<vmem>>, vector<64x128xf32>
    %cst = arith.constant dense<0.000000e+00> : vector<16x128xf32>
    %7 = tpu.matmul %5, %6, %cst {dimension_numbers = #tpu.dot_dimension_numbers<[1], [0], [0], [1], [0, 0, 1, 1], [], []>} : vector<16x64xf32>, vector<64x128xf32>, vector<16x128xf32> -> vector<16x128xf32>
    %c0_3 = arith.constant 0 : index
    %c0_4 = arith.constant 0 : index
    %8 = vector.load %arg3[%c0_3, %c0_4] : memref<16x128xf32, #tpu.memory_space<vmem>>, vector<16x128xf32>
    tpu.vector_store %arg3[%c0_3, %c0_4], %7 {strides = array<i32>} : memref<16x128xf32, #tpu.memory_space<vmem>>, vector<16x128xf32>,
    return
  }
  func.func @transform_0(%arg0: i32) -> (i32, i32) {
    %c0_i32 = arith.constant 0 : i32
    %c0_i32_0 = arith.constant 0 : i32
    return %arg0, %c0_i32 : i32, i32
  }
  func.func @transform_1(%arg0: i32) -> (i32, i32) {
    %c0_i32 = arith.constant 0 : i32
    %c0_i32_0 = arith.constant 0 : i32
    %c0_i32_1 = arith.constant 0 : i32
    return %c0_i32, %c0_i32_0 : i32, i32
  }
  func.func @transform_2(%arg0: i32) -> (i32, i32) {
    %c0_i32 = arith.constant 0 : i32
    %c0_i32_0 = arith.constant 0 : i32
    return %arg0, %c0_i32 : i32, i32
  }
}

</mosaic_0001>

<bundles_post_ra>
// kernel: tpu_custom_call.1
= control target key start
LH: loop header
LB: loop body
LE: loop exit
PB: predicated region body
PF: predicated region fallthrough
CT: control target
= control target key end

     0   :  { %7 = vsyncpa [#allocation3], 0  ;;  %s312_s0 = inlined_call_operand.vmem [shape: s32[16,1], index: 0, kind: input, shape index: {}]   ;;  %s313_s1 = inlined_call_operand.hbm [shape: f32[64,128], index: 1, kind: input, shape index: {}]   ;;  %s314_s2 = inlined_call_operand.hbm [shape: f32[16,128], index: 2, kind: output, shape index: {}]  }
   0x1   :  { %8 = vsyncpa [#allocation4], 0  ;;  %s255_s9 = smov [#allocation2]   ;;  %s207_s13 = scalar_lea.hbm %s313_s1, 1024 }
   0x2   :  { %s16_s10 = sshll.u32 %s255_s9, 4  ;;  %p208_p0 = scmp.ne.s32.totalorder %s313_s1, %s207_s13  ;;  %s17_s10 = int_to_ptr.vmem [resolvable:$true] %s16_s10 }
   0x3   :  { %p211_p1 = scmp.lt.u32.totalorder %s207_s13, %s313_s1 }
   0x5   :  { %p213_p2 = pnand %p211_p1, %p208_p0 }
   0x7   :  { %216 = shalt.err (!%p213_p2)
}
   0x8   :  { %s217_s18 = scalar_lea.vmem %s17_s10, 1024  ;;  %p222_p4 = scmp.lt.s32.totalorder %s17_s10, %s17_s10 }
   0x9   :  { %p218_p3 = scmp.ne.s32.totalorder %s17_s10, %s217_s18  ;;  %p223_p5 = scmp.lt.s32.totalorder %s217_s18, %s217_s18 }
   0xb   :  { %p224_p6 = por %p223_p5, %p222_p4 }
   0xd   :  { %p225_p7 = pnand %p224_p6, %p218_p3 }
   0xf   :  { %228 = shalt.err (!%p225_p7)
}
  0x10   :  { %s256_s19 = smov 128   ;;  %s257_s20 = smov 8  }
  0x11   :  { %22 = dma.hbm_to_vmem [thread:$0]  %s313_s1, 1024, %s17_s10, [#allocation3], %s256_s19, %s256_s19, %s257_s20  }
  0x12   :  { %251 = dma.done.wait [#allocation3], 1024  }
  0x13   :  { %252 = vsyncadd [#allocation3], 4294966272  ;;  %v258_v0 = vmov 0   ;;  %v26_v1 = vld [vmem:[%s312_s0] sm:$0xff]  ;;  %v43_v3 = vld [vmem:[#allocation2 + $0x8] sm:$0xff]  ;;  %v28_v15 = vlaneseq  ;;  %vm50_vm0 = vcmask 523264  }
  0x14   :  { %206 = vset.pattern.permute.xlu0 %v258_v0  ;;  %v42_v2 = vld [vmem:[#allocation2] sm:$0xff]  ;;  %v44_v4 = vld [vmem:[#allocation2 + $0x10] sm:$0xff]  ;;  %v45_v5 = vld [vmem:[#allocation2 + $0x18] sm:$0xff]  ;;  %v259_v18 = vmov 0.0  }
  0x15   :  { %31 = vperm.xlu0 %206, %v26_v1   ;;  %v27_v6 = vld [vmem:[%s312_s0 + $0x8] sm:$0xff]  ;;  %v184_v7 = vpack.c.bf16 %v43_v3, %v42_v2  ;;  %v188_v8 = vpack.c.bf16 %v45_v5, %v44_v4  ;;  %v46_v9 = vld [vmem:[#allocation2 + $0x20] sm:$0xff]  ;;  %v48_v12 = vld [vmem:[#allocation2 + $0x30] sm:$0xff]  ;;  %v29_v16 = vand.u32 127, %v28_v15  ;;  %s260_s0 = smov [#allocation5]  }
  0x16   :  { %v47_v10 = vld [vmem:[#allocation2 + $0x28] sm:$0xff]  ;;  %v49_v13 = vld [vmem:[#allocation2 + $0x38] sm:$0xff]  ;;  %s139_s1 = sshll.u32 %s260_s0, 4  ;;  %s140_s1 = int_to_ptr.vmem [resolvable:$true] %s139_s1 }
  0x17   :  { %185 = vmatprep.subr.bf16.mxu0 %v184_v7  ;;  %v192_v11 = vpack.c.bf16 %v47_v10, %v46_v9  ;;  %v196_v14 = vpack.c.bf16 %v49_v13, %v48_v12  ;;  %s229_s27 = scalar_lea.vmem %s140_s1, 256  ;;  %p234_p9 = scmp.lt.s32.totalorder %s140_s1, %s140_s1 }
  0x18   :  { %187 = vmatpush3.bf16.msra.mxu0 %v184_v7  ;;  %p230_p8 = scmp.ne.s32.totalorder %s140_s1, %s229_s27  ;;  %p235_p10 = scmp.lt.s32.totalorder %s229_s27, %s229_s27 }
  0x19   :  { %34 = vperm.xlu0 %206, %v27_v6   ;;  %189 = vmatprep.subr.bf16.mxu0 %v188_v8 }
  0x1a   :  { %p236_p11 = por %p235_p10, %p234_p9 }
  0x1c   :  { %191 = vmatpush3.bf16.msra.mxu0 %v188_v8  ;;  %p237_p12 = pnand %p236_p11, %p230_p8 }
  0x1d   :  { %193 = vmatprep.subr.bf16.mxu0 %v192_v11 }
  0x20   :  { %195 = vmatpush3.bf16.msra.mxu0 %v192_v11 }
  0x21   :  { %197 = vmatprep.subr.bf16.mxu0 %v196_v14 }
  0x24   :  { %199 = vmatpush3.bf16.msra.mxu0 %v196_v14 }
  0x94   :  { %v32_v17 = vpop.permute.xlu0 %31 }
  0x95   :  { %vm36_vm1 = vcmp.eq.s32.totalorder %v32_v17, %v29_v16 }
  0x96   :  { %v151_v19 = vsel %vm36_vm1, 1.0, %v259_v18 }
  0x97   :  { %181 = vmatprep.mubr.msk.f32.mxu0 %vm50_vm0, %v151_v19 }
  0x98   :  { %v35_v20 = vpop.permute.xlu0 %34 }
  0x99   :  { %vm37_vm2 = vcmp.eq.s32.totalorder %v35_v20, %v29_v16 }
  0x9a   :  { %v152_v21 = vsel %vm37_vm2, 1.0, %v259_v18 }
  0x9b   :  { %182 = vmatmul.mubr.msk.f32.vlgmr.msra.gmra.mrb[0].mxu0 %vm50_vm0, %v152_v21 }
 0x16e   :  { %v183_v22 = vpop.f32.mrb[0].mxu0 }
 0x16f   :  { %133 = vst [vmem:[#allocation5 + $0x8] sm:$0xff] %v183_v22  ;;  %v123_v23 = vpop.f32.mrb[1].mxu0 }
 0x170   :  { %132 = vst [vmem:[#allocation5] sm:$0xff] %v123_v23 }
 0x171   :  { %240 = shalt.err (!%p237_p12)
}
 0x172   :  { %s241_s30 = scalar_lea.hbm %s314_s2, 256 }
 0x173   :  { %p242_p13 = scmp.ne.s32.totalorder %s314_s2, %s241_s30  ;;  %p245_p0 = scmp.lt.u32.totalorder %s241_s30, %s314_s2 }
 0x175   :  { %p247_p1 = pnand %p245_p0, %p242_p13 }
 0x177   :  { %250 = shalt.err (!%p247_p1)
}
 0x178   :  { %145 = dma.vmem_to_hbm [thread:$0]  %s140_s1, 256, %s314_s2, [#allocation4], %s256_s19, %s256_s19, %s257_s20  }
 0x179   :  { %253 = dma.done.wait [#allocation4], 256  }
 0x17a   :  { %254 = vsyncadd [#allocation4], 4294967040 }
 0x17b   :  { %149 = vsyncpa [#allocation3], 1 }
 0x17c   :  { %150 = vsyncpa [#allocation4], 1 }

</bundles_post_ra>
